<compile_context>
chip_gen: v6e
topology: v6e:2x2x1
jax: 0.10.0
libtpu: 0.0.40
codegen_flags: <defaults>
</compile_context>

<pallas_src>
from functools import partial

import jax
import jax.numpy as jnp
from jax.experimental import pallas as pl
from jax.experimental.pallas import tpu as pltpu


# ----------------------------- kernels --------------------------------------


def _rgcn_kernel_fused(adj_ref, feat_ref, w_ref, y_ref, *, w_resident):
    """y += (inv_r * (A_r @ X)) @ W_r ; W_r pre-transposed to (F_in, F_out)."""
    r = pl.program_id(1)

    @pl.when(r == 0)
    def _init():
        y_ref[...] = jnp.zeros_like(y_ref)

    A = adj_ref[0].astype(jnp.bfloat16)                       # int8 {0,1} -> bf16, exact
    # In-kernel degree normalization: exact f32 row-sum of a 0/1 tile (XLU reduce).
    deg = jnp.sum(A.astype(jnp.float32), axis=1, keepdims=True)
    inv = 1.0 / jnp.maximum(deg, 1.0)                         # (TM, 1) f32

    W = w_ref[r] if w_resident else w_ref[0]                  # (F_in_p, F_out_p) bf16
    af = jnp.dot(A, feat_ref[...], preferred_element_type=jnp.float32)   # (TM, F_in_p)
    af = (inv * af).astype(jnp.bfloat16)                      # scale the narrower tensor
    y_ref[...] += jnp.dot(af, W, preferred_element_type=jnp.float32)

    @pl.when(r == pl.num_programs(1) - 1)
    def _fin():
        y_ref[...] = jax.nn.sigmoid(y_ref[...])


def _rgcn_kernel_single(adj_ref, z_ref, y_ref, *, z_resident):
    """y += inv_r * (A_r @ Z_r) with Z_r = X @ W_r^T precomputed in the wrapper."""
    r = pl.program_id(1)

    @pl.when(r == 0)
    def _init():
        y_ref[...] = jnp.zeros_like(y_ref)

    A = adj_ref[0].astype(jnp.bfloat16)                       # (TM, N_pc) bf16
    deg = jnp.sum(A.astype(jnp.float32), axis=1, keepdims=True)
    inv = 1.0 / jnp.maximum(deg, 1.0)                         # (TM, 1) f32

    Z = z_ref[r] if z_resident else z_ref[0]                  # (N_pc, F_out_p) bf16
    y_ref[...] += inv * jnp.dot(A, Z, preferred_element_type=jnp.float32)

    @pl.when(r == pl.num_programs(1) - 1)
    def _fin():
        y_ref[...] = jax.nn.sigmoid(y_ref[...])


# ----------------------------- planning --------------------------------------


def _round_up(x, m):
    return ((x + m - 1) // m) * m


def _vmem_capacity_bytes():
    """Generation-aware VMEM capacity; conservative 64 MiB (v7x per-TC) fallback."""
    try:
        cap = getattr(pltpu.get_tpu_info(), "vmem_capacity_bytes", None)
        if cap:
            return int(cap)
    except Exception:
        pass
    return 64 * 2**20


def _plan(n, est_fn):
    """Pick (TM, N_pr, resident, vmem_limit_bytes).

    est_fn(tm, resident) -> estimated VMEM working set in bytes.
    Preference order: resident all-R blocks (fewer HBM re-fetches) over larger TM;
    TM=256 only considered when it still yields >= 2 row tiles (megacore balance).
    """
    cap = _vmem_capacity_bytes()
    budget = int(0.70 * cap)

    choices = []
    if _round_up(n, 256) >= 512:
        choices += [(256, True), (256, False)]
    choices += [(128, True), (128, False)]
    choices.sort(key=lambda c: (not c[1], -c[0]))   # resident first, then larger TM

    for tm, resident in choices:
        est = est_fn(tm, resident)
        if est <= budget:
            limit = int(min(int(0.9 * cap), max(2 * est, 32 * 2**20)))
            return tm, _round_up(n, tm), resident, limit

    # TODO(synk): K-tile the contraction dim instead of over-committing VMEM here.
    tm, resident = 128, False
    est = est_fn(tm, resident)
    return tm, _round_up(n, tm), resident, int(min(int(0.95 * cap), max(est, 32 * 2**20)))


# ----------------------------- wrapper ---------------------------------------


def convolutional_layer_forward(adjacency, features, weight):
    """adjacency: (R, N, N) f32 {0,1}, features: (N, F_in) f32, weight: (R, F_out, F_in) f32.

    Returns sigmoid(sum_r diag(1/deg_r) A_r X W_r^T) as (N, F_out) f32.
    """
    R, N, _ = adjacency.shape
    F_in = features.shape[1]
    F_out = weight.shape[1]

    F_in_p = _round_up(F_in, 128)
    F_out_p = _round_up(F_out, 128)
    N_pc = _round_up(N, 128)               # column / contraction padding (lane-dense)

    single_matmul = F_out_p < F_in_p       # association chosen by min(F_in, F_out)

    if single_matmul:
        def est(tm, resident):
            z_rel = R if resident else 1
            return (2 * tm * N_pc                     # adjacency tile, int8, 2 buffers
                    + 2 * z_rel * N_pc * F_out_p * 2  # Z block(s), bf16, 2 buffers
                    + 2 * tm * F_out_p * 4            # f32 output block, 2 buffers
                    + tm * N_pc * 4)                  # headroom (in-kernel f32 reduce)
    else:
        def est(tm, resident):
            w_rel = R if resident else 1
            return (2 * tm * N_pc
                    + 2 * N_pc * F_in_p * 2           # resident feature slab, bf16
                    + 2 * w_rel * F_in_p * F_out_p * 2
                    + 2 * tm * F_out_p * 4
                    + tm * max(N_pc, F_in_p) * 4)

    TM, N_pr, resident, vmem_limit = _plan(N, est)

    # Adjacency streamed as int8 ({0,1} assumed); single cast+pad pass in XLA.
    # TODO(synk): weighted adjacency would need a bf16/f32 stream + explicit nonzero count.
    adj_p = jnp.pad(adjacency.astype(jnp.int8),
                    ((0, 0), (0, N_pr - N), (0, N_pc - N)))

    grid = (N_pr // TM, R)
    out_shape = jax.ShapeDtypeStruct((N_pr, F_out_p), jnp.float32)
    adj_spec = pl.BlockSpec((1, TM, N_pc), lambda m, r: (r, m, 0))
    out_spec = pl.BlockSpec((TM, F_out_p), lambda m, r: (m, 0))
    cparams = pltpu.CompilerParams(
        dimension_semantics=("parallel", "arbitrary"),
        vmem_limit_bytes=vmem_limit,
    )

    if single_matmul:
        # Precompute Z_r = X @ W_r^T once (cheap vs the N^2-scaled work).
        xb = features.astype(jnp.bfloat16)
        wb = weight.astype(jnp.bfloat16)
        z = jnp.einsum("nf,rof->rno", xb, wb,
                       preferred_element_type=jnp.float32).astype(jnp.bfloat16)
        z_p = jnp.pad(z, ((0, 0), (0, N_pc - N), (0, F_out_p - F_out)))
        if resident:     # all relations loaded once (constant index map)
            z_spec = pl.BlockSpec((R, N_pc, F_out_p), lambda m, r: (0, 0, 0))
        else:            # fallback: stream Z_r per relation step
            z_spec = pl.BlockSpec((1, N_pc, F_out_p), lambda m, r: (r, 0, 0))
        y_p = pl.pallas_call(
            partial(_rgcn_kernel_single, z_resident=resident),
            out_shape=out_shape,
            grid_spec=pltpu.PrefetchScalarGridSpec(
                num_scalar_prefetch=0,
                grid=grid,
                in_specs=[adj_spec, z_spec],
                out_specs=out_spec,
            ),
            compiler_params=cparams,
        )(adj_p, z_p)
    else:
        feat_p = jnp.pad(features, ((0, N_pc - N), (0, F_in_p - F_in))).astype(jnp.bfloat16)
        # Pre-transposed weights (R, F_in, F_out): no in-kernel transpose, F_out lane-dense.
        w_t = jnp.transpose(weight, (0, 2, 1))
        w_p = jnp.pad(w_t, ((0, 0), (0, F_in_p - F_in),
                            (0, F_out_p - F_out))).astype(jnp.bfloat16)
        feat_spec = pl.BlockSpec((N_pc, F_in_p), lambda m, r: (0, 0))
        if resident:
            w_spec = pl.BlockSpec((R, F_in_p, F_out_p), lambda m, r: (0, 0, 0))
        else:
            w_spec = pl.BlockSpec((1, F_in_p, F_out_p), lambda m, r: (r, 0, 0))
        y_p = pl.pallas_call(
            partial(_rgcn_kernel_fused, w_resident=resident),
            out_shape=out_shape,
            grid_spec=pltpu.PrefetchScalarGridSpec(
                num_scalar_prefetch=0,
                grid=grid,
                in_specs=[adj_spec, feat_spec, w_spec],
                out_specs=out_spec,
            ),
            compiler_params=cparams,
        )(adj_p, feat_p, w_p)

    return y_p[:N, :F_out]


# ----------------------------- references ------------------------------------


def _reference_f32(adjacency, features, weight):
    """Straight port of the PyTorch forward in f32."""
    y = jnp.zeros((features.shape[0], weight.shape[1]), jnp.float32)
    for r in range(adjacency.shape[0]):
        cnt = jnp.count_nonzero(adjacency[r], axis=1).astype(jnp.float32)
        cnt = jnp.where(cnt == 0.0, 1.0, cnt)
        inv = (1.0 / cnt)[:, None]
        y = y + inv * (adjacency[r] @ features @ weight[r].T)
    return jax.nn.sigmoid(y)


def _reference_matched_fused(adjacency, features, weight):
    """Mirror of the kernel's bf16-input / f32-accumulate numerics (fused path)."""
    A = adjacency.astype(jnp.bfloat16)
    X = features.astype(jnp.bfloat16)
    Wt = jnp.transpose(weight, (0, 2, 1)).astype(jnp.bfloat16)
    cnt = jnp.count_nonzero(adjacency, axis=2).astype(jnp.float32)
    inv = (1.0 / jnp.where(cnt == 0.0, 1.0, cnt))[..., None]
    y = jnp.zeros((features.shape[0], weight.shape[1]), jnp.float32)
    for r in range(adjacency.shape[0]):
        af = jnp.dot(A[r], X, preferred_element_type=jnp.float32)
        af = (inv[r] * af).astype(jnp.bfloat16)
        y = y + jnp.dot(af, Wt[r], preferred_element_type=jnp.float32)
    return jax.nn.sigmoid(y)


def _reference_matched_single(adjacency, features, weight):
    """Mirror of the kernel's numerics for the single-matmul (precomputed Z) path."""
    A = adjacency.astype(jnp.bfloat16)
    X = features.astype(jnp.bfloat16)
    W = weight.astype(jnp.bfloat16)
    Z = jnp.einsum("nf,rof->rno", X, W,
                   preferred_element_type=jnp.float32).astype(jnp.bfloat16)
    cnt = jnp.count_nonzero(adjacency, axis=2).astype(jnp.float32)
    inv = (1.0 / jnp.where(cnt == 0.0, 1.0, cnt))[..., None]
    y = jnp.zeros((features.shape[0], weight.shape[1]), jnp.float32)
    for r in range(adjacency.shape[0]):
        y = y + inv[r] * jnp.dot(A[r], Z[r], preferred_element_type=jnp.float32)
    return jax.nn.sigmoid(y)


# ----------------------------- test harness ----------------------------------


def _run_case(name, R, N, F_in, F_out, density, key, atol_f32):
    k_adj, k_feat, k_w = jax.random.split(key, 3)
    adjacency = (jax.random.uniform(k_adj, (R, N, N)) < density).astype(jnp.float32)
    features = jax.random.normal(k_feat, (N, F_in), dtype=jnp.float32)
    weight = jax.random.normal(k_w, (R, F_out, F_in), dtype=jnp.float32)

    y = jax.block_until_ready(convolutional_layer_forward(adjacency, features, weight))
    assert y.shape == (N, F_out), f"{name}: bad output shape {y.shape}"

    if _round_up(F_out, 128) < _round_up(F_in, 128):
        y_match = _reference_matched_single(adjacency, features, weight)
    else:
        y_match = _reference_matched_fused(adjacency, features, weight)
    y_f32 = _reference_f32(adjacency, features, weight)

    assert jnp.allclose(y, y_match, atol=2e-3, rtol=0.0), \
        f"{name}: mismatch vs bf16-matched reference"
    assert jnp.allclose(y, y_f32, atol=atol_f32, rtol=0.0), \
        f"{name}: mismatch vs f32 reference"


if __name__ == "__main__":
    key = jax.random.PRNGKey(0)
    k1, k2 = jax.random.split(key)

    # Case 1: square features -> fused two-matmul path ((A @ X) @ W^T).
    _run_case("fused", R=3, N=16, F_in=32, F_out=32, density=0.25,
              key=k1, atol_f32=5e-2)

    # Case 2: wide-in / narrow-out -> single-matmul path (A @ (X @ W^T)).
    _run_case("single", R=2, N=24, F_in=200, F_out=32, density=0.25,
              key=k2, atol_f32=1e-1)

    print("KERNEL_OK")
</pallas_src>

<mosaic_0001>
module attributes {stable_mosaic.version = 11 : i64} {
  func.func @_rgcn_kernel_fused(%arg0: i32, %arg1: i32, %arg2: memref<1x128x128xi8, #tpu.memory_space<vmem>>, %arg3: memref<128x128xbf16, #tpu.memory_space<vmem>>, %arg4: memref<3x128x128xbf16, #tpu.memory_space<vmem>>, %arg5: memref<128x128xf32, #tpu.memory_space<vmem>>) attributes {dimension_semantics = [#tpu.dimension_semantics<parallel>, #tpu.dimension_semantics<arbitrary>], iteration_bounds = array<i64: 1, 3>, scalar_prefetch = 0 : i64, scratch_operands = 0 : i64, tpu.core_type = #tpu.core_type<tc>, window_params = [{transform_indices = @transform_0, window_bounds = array<i64: 1, 128, 128>}, {pipeline_mode = #tpu.pipeline_mode<synchronous>, transform_indices = @transform_1, window_bounds = array<i64: 128, 128>}, {pipeline_mode = #tpu.pipeline_mode<synchronous>, transform_indices = @transform_2, window_bounds = array<i64: 3, 128, 128>}, {transform_indices = @transform_3, window_bounds = array<i64: 128, 128>}]} {
    %c0_i32 = arith.constant 0 : i32
    %0 = arith.cmpi eq, %arg1, %c0_i32 : i32
    %1 = arith.extui %0 : i1 to i32
    %c0_i32_0 = arith.constant 0 : i32
    %2 = arith.cmpi ne, %1, %c0_i32_0 : i32
    scf.if %2 {
      %cst_16 = arith.constant 0.000000e+00 : f32
      %28 = vector.broadcast %cst_16 : f32 to vector<128x128xf32>
      %c0_17 = arith.constant 0 : index
      %c0_18 = arith.constant 0 : index
      %29 = vector.load %arg5[%c0_17, %c0_18] : memref<128x128xf32, #tpu.memory_space<vmem>>, vector<128x128xf32>
      tpu.vector_store %arg5[%c0_17, %c0_18], %28 {strides = array<i32>} : memref<128x128xf32, #tpu.memory_space<vmem>>, vector<128x128xf32>,
    } else {
    }
    %c0 = arith.constant 0 : index
    %c0_1 = arith.constant 0 : index
    %c0_2 = arith.constant 0 : index
    %3 = vector.load %arg2[%c0, %c0_1, %c0_2] : memref<1x128x128xi8, #tpu.memory_space<vmem>>, vector<1x128x128xi8>
    %4 = vector.shape_cast %3 : vector<1x128x128xi8> to vector<128x128xi8>
    %5 = arith.sitofp %4 : vector<128x128xi8> to vector<128x128xbf16>
    %6 = arith.extf %5 : vector<128x128xbf16> to vector<128x128xf32>
    %cst = arith.constant dense<0.000000e+00> : vector<128xf32>
    %7 = vector.multi_reduction <add>, %6, %cst [1] : vector<128x128xf32> to vector<128xf32>
    %8 = vector.shape_cast %7 : vector<128xf32> to vector<128x1xf32>
    %cst_3 = arith.constant 1.000000e+00 : f32
    %9 = vector.broadcast %cst_3 : f32 to vector<128x1xf32>
    %10 = arith.maximumf %8, %9 : vector<128x1xf32>
    %cst_4 = arith.constant 1.000000e+00 : f32
    %11 = vector.broadcast %cst_4 : f32 to vector<128x1xf32>
    %12 = arith.divf %11, %10 : vector<128x1xf32>
    %13 = arith.index_cast %arg1 : i32 to index
    %c0_5 = arith.constant 0 : index
    %c0_6 = arith.constant 0 : index
    %14 = vector.load %arg4[%13, %c0_5, %c0_6] : memref<3x128x128xbf16, #tpu.memory_space<vmem>>, vector<1x128x128xbf16>
    %15 = vector.shape_cast %14 : vector<1x128x128xbf16> to vector<128x128xbf16>
    %c0_7 = arith.constant 0 : index
    %c0_8 = arith.constant 0 : index
    %16 = vector.load %arg3[%c0_7, %c0_8] : memref<128x128xbf16, #tpu.memory_space<vmem>>, vector<128x128xbf16>
    %cst_9 = arith.constant dense<0.000000e+00> : vector<128x128xf32>
    %17 = tpu.matmul %5, %16, %cst_9 {dimension_numbers = #tpu.dot_dimension_numbers<[1], [0], [0], [1], [0, 0, 1, 1], [], []>} : vector<128x128xbf16>, vector<128x128xbf16>, vector<128x128xf32> -> vector<128x128xf32>
    %18 = vector.broadcast %12 : vector<128x1xf32> to vector<128x128xf32>
    %19 = arith.mulf %18, %17 : vector<128x128xf32>
    %20 = arith.truncf %19 : vector<128x128xf32> to vector<128x128xbf16>
    %c0_10 = arith.constant 0 : index
    %c0_11 = arith.constant 0 : index
    %21 = vector.load %arg5[%c0_10, %c0_11] : memref<128x128xf32, #tpu.memory_space<vmem>>, vector<128x128xf32>
    %cst_12 = arith.constant dense<0.000000e+00> : vector<128x128xf32>
    %22 = tpu.matmul %20, %15, %cst_12 {dimension_numbers = #tpu.dot_dimension_numbers<[1], [0], [0], [1], [0, 0, 1, 1], [], []>} : vector<128x128xbf16>, vector<128x128xbf16>, vector<128x128xf32> -> vector<128x128xf32>
    %23 = arith.addf %21, %22 : vector<128x128xf32>
    %c0_13 = arith.constant 0 : index
    %c0_14 = arith.constant 0 : index
    %24 = vector.load %arg5[%c0_13, %c0_14] : memref<128x128xf32, #tpu.memory_space<vmem>>, vector<128x128xf32>
    tpu.vector_store %arg5[%c0_13, %c0_14], %23 {strides = array<i32>} : memref<128x128xf32, #tpu.memory_space<vmem>>, vector<128x128xf32>,
    %c2_i32 = arith.constant 2 : i32
    %25 = arith.cmpi eq, %arg1, %c2_i32 : i32
    %26 = arith.extui %25 : i1 to i32
    %c0_i32_15 = arith.constant 0 : i32
    %27 = arith.cmpi ne, %26, %c0_i32_15 : i32
    scf.if %27 {
      %c0_16 = arith.constant 0 : index
      %c0_17 = arith.constant 0 : index
      %28 = vector.load %arg5[%c0_16, %c0_17] : memref<128x128xf32, #tpu.memory_space<vmem>>, vector<128x128xf32>
      %29 = arith.negf %28 : vector<128x128xf32>
      %30 = math.exp %29 : vector<128x128xf32>
      %cst_18 = arith.constant 1.000000e+00 : f32
      %31 = vector.broadcast %cst_18 : f32 to vector<128x128xf32>
      %32 = arith.addf %31, %30 : vector<128x128xf32>
      %33 = arith.divf %31, %32 : vector<128x128xf32>
      %c0_19 = arith.constant 0 : index
      %c0_20 = arith.constant 0 : index
      %34 = vector.load %arg5[%c0_19, %c0_20] : memref<128x128xf32, #tpu.memory_space<vmem>>, vector<128x128xf32>
      tpu.vector_store %arg5[%c0_19, %c0_20], %33 {strides = array<i32>} : memref<128x128xf32, #tpu.memory_space<vmem>>, vector<128x128xf32>,
    } else {
    }
    return
  }
  func.func @transform_0(%arg0: i32, %arg1: i32) -> (i32, i32, i32) {
    %c0_i32 = arith.constant 0 : i32
    %c0_i32_0 = arith.constant 0 : i32
    return %arg1, %arg0, %c0_i32 : i32, i32, i32
  }
  func.func @transform_1(%arg0: i32, %arg1: i32) -> (i32, i32) {
    %c0_i32 = arith.constant 0 : i32
    %c0_i32_0 = arith.constant 0 : i32
    %c0_i32_1 = arith.constant 0 : i32
    return %c0_i32, %c0_i32_0 : i32, i32
  }
  func.func @transform_2(%arg0: i32, %arg1: i32) -> (i32, i32, i32) {
    %c0_i32 = arith.constant 0 : i32
    %c0_i32_0 = arith.constant 0 : i32
    %c0_i32_1 = arith.constant 0 : i32
    %c0_i32_2 = arith.constant 0 : i32
    return %c0_i32, %c0_i32_0, %c0_i32_1 : i32, i32, i32
  }
  func.func @transform_3(%arg0: i32, %arg1: i32) -> (i32, i32) {
    %c0_i32 = arith.constant 0 : i32
    %c0_i32_0 = arith.constant 0 : i32
    return %arg0, %c0_i32 : i32, i32
  }
}

</mosaic_0001>

<bundles_post_ra>
// kernel: tpu_custom_call.1
= control target key start
LH: loop header
LB: loop body
LE: loop exit
PB: predicated region body
PF: predicated region fallthrough
CT: control target
= control target key end

     0   :  { %8 = vsyncpa [#allocation3], 0  ;;  %s1698_s0 = inlined_call_operand.hbm [shape: s8[3,128,128], index: 0, kind: input, shape index: {}]   ;;  %s1699_s1 = inlined_call_operand.hbm [shape: bf16[128,128], index: 1, kind: input, shape index: {}]   ;;  %s1700_s2 = inlined_call_operand.hbm [shape: bf16[3,128,128], index: 2, kind: input, shape index: {}]   ;;  %s1701_s3 = inlined_call_operand.hbm [shape: f32[128,128], index: 3, kind: output, shape index: {}]  }
   0x1   :  { %10 = vsyncpa [#allocation3 + $0x1], 0 }
   0x2   :  { %11 = vsyncpa [#allocation6], 0 }
   0x3   :  { %12 = vsyncpa [#allocation4], 0  ;;  %s1531_s12 = smov 0   ;;  %s1533_s13 = smov 0  }
   0x4   :  { %s1535_s14 = smov 0   ;;  %s1537_s15 = smov 0  }
   0x5   :  { %s1539_s16 = smov 0   ;;  %s1541_s17 = smov 0  }
   0x6 LB: > { %s984_s18 = sadd.s32 4294967295, %s1498_s17   ;;  %p52_p0 = scmp.ne.s32.totalorder %s1482_s13, %s1478_s12  ;;  %s1498_s17 = sphi %s1541_s17, %s18_s17   ;;  %s1494_s16 = sphi %s1539_s16, %s1715_s16   ;;  %s1490_s15 = sphi %s1537_s15, %s1714_s15   ;;  %s1486_s14 = sphi %s1535_s14, %s1713_s14   ;;  %s1482_s13 = sphi %s1533_s13, %s1712_s13   ;;  %s1478_s12 = sphi %s1531_s12, %s1711_s12  }
   0x7   : > { %p1563_p1 = scmp.eq.s32.totalorder %s984_s18, 0  ;;  %p985_p2 = scmp.ge.s32.totalorder %s1498_s17, 1 }
   0x8   : > { %p131_p3 = scmp.lt.s32.totalorder %s1498_s17, 4  ;;  %s1500_s22 = smov [#allocation5]  }
   0x9   : > { %s1704_s19 = scalar_select %p1563_p1, 1, 0 }
   0xa   : > { %p1571_p4 = por %p1563_p1, %p52_p0  ;;  %p1575_p5 = pnand %p985_p2, %p131_p3 }
   0xb   : > { %s143_s23 = sshll.u32 %s1500_s22, 4  ;;  %s1501_s25 = smov [#allocation7]   ;;  %s144_s23 = int_to_ptr.vmem [resolvable:$true] %s143_s23 }
   0xc   : > { %p1148_p6 = pneg %p1575_p5  ;;  %s156_s26 = sshll.u32 %s1501_s25, 4  ;;  %s157_s26 = int_to_ptr.vmem [resolvable:$true] %s156_s26 }
   0xd   : > { %s1347_s27 = scalar_lea.vmem %s144_s23, 1024  ;;  %p1355_p12 = scmp.lt.s32.totalorder %s144_s23, %s144_s23 }
   0xe   : > { %p1583_p7 = pnand %p1148_p6, %p1563_p1  ;;  %p1348_p9 = scmp.ne.s32.totalorder %s144_s23, %s1347_s27 }
   0xf   : > { %p1356_p13 = scmp.lt.s32.totalorder %s1347_s27, %s1347_s27 }
  0x10   : > { %p1338_p8 = pneg %p1583_p7 }
  0x11   : > { %p1357_p0 = por %p1356_p13, %p1355_p12 }
  0x12   : > { %p1350_p10 = pnand %p1348_p9, %p1338_p8 }
  0x14   : > { %p1351_p11 = pneg %p1350_p10 }
  0x16   : > { %p1358_p2 = pnand %p1357_p0, %p1351_p11 }
  0x18   : > { %1361 = shalt.err (!%p1358_p2)
}
  0x19   : > { %s1502_s28 = smov 64   ;;  %s1503_s29 = smov 4  }
  0x1a   : > { %1151 = dma.hbm_to_vmem [thread:$0]  (!%p1583_p7), %s1699_s1, 1024, %s144_s23, [#allocation6], %s1502_s28, %s1502_s28, %s1503_s29  }
  0x1b   : > { %s1373_s5 = scalar_lea.vmem %s157_s26, 3072  ;;  %p1381_p10 = scmp.lt.s32.totalorder %s157_s26, %s157_s26 }
  0x1c   : > { %p1374_p3 = scmp.ne.s32.totalorder %s157_s26, %s1373_s5  ;;  %p1382_p1 = scmp.lt.s32.totalorder %s1373_s5, %s1373_s5 }
  0x1e   : > { %p1376_p6 = pnand %p1374_p3, %p1338_p8  ;;  %p1383_p12 = por %p1382_p1, %p1381_p10 }
  0x20   : > { %p1377_p9 = pneg %p1376_p6 }
  0x22   : > { %p1384_p11 = pnand %p1383_p12, %p1377_p9 }
  0x24   : > { %1387 = shalt.err (!%p1384_p11)
}
  0x25   : > { %1154 = dma.hbm_to_vmem [thread:$0]  (!%p1583_p7), %s1700_s2, 3072, %s157_s26, [#allocation6], %s1502_s28, %s1502_s28, %s1503_s29  }
  0x26   : > { %s27_s8 = sadd.s32 1, %s1494_s16  ;;  %s39_s9 = sadd.s32 1, %s1486_s14 }
  0x27   : > { %p28_p1 = scmp.ge.s32.totalorder %s27_s8, 3  ;;  %p46_p8 = scmp.ne.s32.totalorder %s1486_s14, %s1482_s13 }
  0x28   : > { %p47_p13 = scmp.eq.s32.totalorder %s1498_s17, 0  ;;  %p1161_p0 = scmp.lt.s32.totalorder %s1498_s17, 3 }
  0x29   : > { %s1717_s8 = smov (%p28_p1, %s27_s8), 0  ;;  %s170_s10 = sand.u32 1, %s1486_s14  }
  0x2a   : > { %p48_p2 = por %p47_p13, %p46_p8  ;;  %s34_s11 = ssub.s32 %s1494_s16, %s1717_s8 }
  0x2b   : > { %p37_p3 = scmp.eq.s32.totalorder %s34_s11, 0  ;;  %s989_s12 = sshll.u32 %s170_s10, 5 }
  0x2c   : > { %s1036_s22 = sshll.u32 %s1494_s16, 9  ;;  %s174_s27 = scalar_lea.vmem [#allocation2], %s989_s12 }
  0x2d   : > { %s1618_s23 = scalar_select %p37_p3, %s1486_s14, %s39_s9  }
  0x2e   : > { %s182_s26 = scalar_lea.hbm %s1698_s0, %s1036_s22  ;;  %s183_s28 = sshll.u32 %s174_s27, 4  ;;  %s184_s28 = int_to_ptr.vmem [resolvable:$true] %s183_s28 }
  0x2f   : > { %p1625_p7 = pnand %p1161_p0, %p48_p2  ;;  %s171_s30 = scalar_lea.sflag [#allocation3], %s170_s10 }
  0x30   : > { %s1401_s4 = scalar_lea.vmem %s184_s28, 512  ;;  %s1504_s5 = smov [#allocation2]  }
  0x31   : > { %p1390_p6 = pneg %p1625_p7  ;;  %p1402_p9 = scmp.ne.s32.totalorder %s184_s28, %s1401_s4 }
  0x32   : > { %s1406_s6 = sshll.u32 %s1504_s5, 4  ;;  %s1407_s6 = int_to_ptr.vmem [resolvable:$false] %s1406_s6 }
  0x33   : > { %p1404_p10 = pnand %p1402_p9, %p1390_p6  ;;  %s1408_s7 = scalar_lea.vmem %s1407_s6, 1024 }
  0x34   : > { %p1409_p11 = scmp.lt.s32.totalorder %s184_s28, %s1407_s6  ;;  %p1410_p1 = scmp.lt.s32.totalorder %s1408_s7, %s1401_s4 }
  0x35   : > { %p1405_p12 = pneg %p1404_p10 }
  0x36   : > { %p1411_p8 = por %p1410_p1, %p1409_p11 }
  0x38   : > { %p1412_p13 = pnand %p1411_p8, %p1405_p12 }
  0x3a   : > { %1415 = shalt.err (!%p1412_p13)
}
  0x3b   : > { %s1505_s9 = smov 128   ;;  %s1506_s11 = smov 8  }
  0x3c   : > { %1158 = dma.hbm_to_vmem [thread:$0]  (!%p1625_p7), %s182_s26, 512, %s184_s28, %s171_s30, %s1505_s9, %s1505_s9, %s1506_s11  }
  0x3d   : > { %195 = sbr.rel (%p1575_p5) target bundleno = 614 (0x266), region = 32  ;;  %s197_s10 = sand.u32 (!%p1575_p5), 1, %s1482_s13  }
  0x3e   : > { %s993_s12 = sshll.u32 (!%p1575_p5), %s197_s10, 5  ;;  %s198_s22 = scalar_lea.sflag (!%p1575_p5), [#allocation3], %s197_s10 }
  0x3f   : > { %s1636_s24 = scalar_lea.vmem (!%p1575_p5), [#allocation2], %s993_s12 }
  0x42   : > { %1465 = dma.done.wait (%p1571_p4), %s198_s22, 512  }
  0x43   : > { %1467 = vsyncadd (%p1571_p4), %s198_s22, 4294966784  ;;  %p1709_p0 = scmp.ne.s32.totalorder %s1704_s19, 0 }
  0x45   : > { %1469 = dma.done.wait (%p1709_p0), [#allocation6], 4096  }
  0x46   : > { %1471 = vsyncadd (%p1709_p0), [#allocation6], 4294963200  ;;  %p996_p5 = scmp.ne.s32.totalorder %s1490_s15, 0 }
  0x48   : > { %233 = sbr.rel (%p996_p5) target bundleno = 86 (0x56), region = 48 }
  0x4d   : > { %v1507_v0 = vmov 0.0  }
  0x4e   : > { %234 = vst [vmem:[#allocation8] sm:$0xff] %v1507_v0  ;;  %235 = vst [vmem:[#allocation8 + $0x8] sm:$0xff] %v1507_v0 }
  0x4f   : > { %236 = vst [vmem:[#allocation8 + $0x10] sm:$0xff] %v1507_v0  ;;  %237 = vst [vmem:[#allocation8 + $0x18] sm:$0xff] %v1507_v0 }
  0x50   : > { %238 = vst [vmem:[#allocation8 + $0x20] sm:$0xff] %v1507_v0  ;;  %239 = vst [vmem:[#allocation8 + $0x28] sm:$0xff] %v1507_v0 }
  0x51   : > { %240 = vst [vmem:[#allocation8 + $0x30] sm:$0xff] %v1507_v0  ;;  %241 = vst [vmem:[#allocation8 + $0x38] sm:$0xff] %v1507_v0 }
  0x52   : > { %242 = vst [vmem:[#allocation8 + $0x40] sm:$0xff] %v1507_v0  ;;  %243 = vst [vmem:[#allocation8 + $0x48] sm:$0xff] %v1507_v0 }
  0x53   : > { %244 = vst [vmem:[#allocation8 + $0x50] sm:$0xff] %v1507_v0  ;;  %245 = vst [vmem:[#allocation8 + $0x58] sm:$0xff] %v1507_v0 }
  0x54   : > { %246 = vst [vmem:[#allocation8 + $0x60] sm:$0xff] %v1507_v0  ;;  %247 = vst [vmem:[#allocation8 + $0x68] sm:$0xff] %v1507_v0 }
  0x55   : > { %248 = vst [vmem:[#allocation8 + $0x70] sm:$0xff] %v1507_v0  ;;  %249 = vst [vmem:[#allocation8 + $0x78] sm:$0xff] %v1507_v0 }
  0x56 PF: > { %v1224_v1 = vld [vmem:[#allocation5 + $0x38] sm:$0xff]   ;;  %v1225_v2 = vld [vmem:[#allocation5 + $0x30] sm:$0xff]   ;;  %v1226_v3 = vld [vmem:[#allocation5 + $0x28] sm:$0xff]   ;;  %s1037_s19 = sshll.u32 %s1490_s15, 6  ;;  %p1015_p4 = scmp.ne.s32.totalorder %s1490_s15, 2 }
  0x57   : > { %1070 = vmatprep.subr.bf16.mxu0 %v1224_v1  ;;  %v1227_v4 = vld [vmem:[#allocation5 + $0x20] sm:$0xff]   ;;  %s1649_s20 = scalar_lea.vmem [#allocation7], %s1037_s19  ;;  %v1228_v8 = vld [vmem:[#allocation5 + $0x18] sm:$0xff]   ;;  %v251_v9 = vld [vmem:[%s1636_s24 + $0x8] sm:$0xff] }
  0x58   : > { %1071 = vmatpush3.bf16.msra.mxu0 %v1224_v1  ;;  %v250_v5 = vld [vmem:[%s1636_s24] sm:$0xff]  ;;  %v1232_v10 = vld [vmem:[%s1649_s20 + $0x38] sm:$0xff]   ;;  %v256_v15 = vunpack.c.l.s8.bf16 %v251_v9  ;;  %v1229_v16 = vld [vmem:[#allocation5 + $0x10] sm:$0xff]   ;;  %v257_v19 = vunpack.c.h.s8.bf16 %v251_v9 }
  0x59   : > { %1072 = vmatprep.subr.bf16.mxu0 %v1225_v2  ;;  %v254_v6 = vunpack.c.l.s8.bf16 %v250_v5  ;;  %v255_v7 = vunpack.c.h.s8.bf16 %v250_v5  ;;  %1102 = vmatprep.subr.bf16.mxu1 %v1232_v10  ;;  %v1230_v20 = vld [vmem:[#allocation5 + $0x8] sm:$0xff]   ;;  %v252_v21 = vld [vmem:[%s1636_s24 + $0x10] sm:$0xff]  ;;  %v1231_v25 = vld [vmem:[#allocation5] sm:$0xff]  }
  0x5a   : > { %1103 = vmatpush3.bf16.msra.mxu1 %v1232_v10  ;;  %v266_v17 = vunpack.c.l.bf16 %v256_v15  ;;  %v267_v18 = vunpack.c.h.bf16 %v256_v15  ;;  %v268_v22 = vunpack.c.l.bf16 %v257_v19  ;;  %v269_v23 = vunpack.c.h.bf16 %v257_v19  ;;  %v1233_v28 = vld [vmem:[%s1649_s20 + $0x30] sm:$0xff]   ;;  %v253_v30 = vld [vmem:[%s1636_s24 + $0x18] sm:$0xff]  ;;  %v1234_v33 = vld [vmem:[%s1649_s20 + $0x28] sm:$0xff]  }
  0x5b   : > { %1086 = vmatprep.mubr.bf16.mxu0 %v254_v6  ;;  %v262_v11 = vunpack.c.l.bf16 %v254_v6  ;;  %v264_v12 = vunpack.c.l.bf16 %v255_v7  ;;  %v263_v13 = vunpack.c.h.bf16 %v254_v6  ;;  %v265_v14 = vunpack.c.h.bf16 %v255_v7  ;;  %1104 = vmatprep.subr.bf16.mxu1 %v1233_v28  ;;  %v1235_v37 = vld [vmem:[%s1649_s20 + $0x20] sm:$0xff]   ;;  %v1236_v41 = vld [vmem:[%s1649_s20 + $0x18] sm:$0xff]   ;;  %v1237_v42 = vld [vmem:[%s1649_s20 + $0x10] sm:$0xff]  }
  0x5c   : > { %1073 = vmatpush3.bf16.msra.mxu0 %v1225_v2  ;;  %v258_v24 = vunpack.c.l.s8.bf16 %v252_v21  ;;  %v259_v29 = vunpack.c.h.s8.bf16 %v252_v21  ;;  %v260_v34 = vunpack.c.l.s8.bf16 %v253_v30  ;;  %v261_v38 = vunpack.c.h.s8.bf16 %v253_v30  ;;  %v1238_v43 = vld [vmem:[%s1649_s20 + $0x8] sm:$0xff]   ;;  %v1239_v44 = vld [vmem:[%s1649_s20] sm:$0xff]  }
  0x5d   : > { %1074 = vmatprep.subr.bf16.mxu0 %v1226_v3  ;;  %278 = vadd.xlane.f32.xlu0 %v262_v11 }
  0x5e   : > { %282 = vadd.xlane.f32.xlu1 %v264_v12  ;;  %v270_v26 = vunpack.c.l.bf16 %v258_v24  ;;  %v271_v27 = vunpack.c.h.bf16 %v258_v24  ;;  %1105 = vmatpush3.bf16.msra.mxu1 %v1233_v28  ;;  %v272_v31 = vunpack.c.l.bf16 %v259_v29  ;;  %v273_v32 = vunpack.c.h.bf16 %v259_v29 }
  0x5f   : > { %1106 = vmatprep.subr.bf16.mxu1 %v1234_v33  ;;  %v274_v35 = vunpack.c.l.bf16 %v260_v34  ;;  %v275_v36 = vunpack.c.h.bf16 %v260_v34  ;;  %v276_v39 = vunpack.c.l.bf16 %v261_v38  ;;  %v277_v40 = vunpack.c.h.bf16 %v261_v38 }
  0x60   : > { %1075 = vmatpush3.bf16.msra.mxu0 %v1226_v3 }
  0x61   : > { %1076 = vmatprep.subr.bf16.mxu0 %v1227_v4  ;;  %280 = vadd.xlane.f32.xlu0 %v263_v13 }
  0x62   : > { %284 = vadd.xlane.f32.xlu1 %v265_v14  ;;  %1107 = vmatpush3.bf16.msra.mxu1 %v1234_v33 }
  0x63   : > { %1108 = vmatprep.subr.bf16.mxu1 %v1235_v37 }
  0x64   : > { %1077 = vmatpush3.bf16.msra.mxu0 %v1227_v4 }
  0x65   : > { %1078 = vmatprep.subr.bf16.mxu0 %v1228_v8  ;;  %286 = vadd.xlane.f32.xlu0 %v266_v17 }
  0x66   : > { %288 = vadd.xlane.f32.xlu1 %v267_v18  ;;  %1109 = vmatpush3.bf16.msra.mxu1 %v1235_v37 }
  0x67   : > { %1110 = vmatprep.subr.bf16.mxu1 %v1236_v41 }
  0x68   : > { %1079 = vmatpush3.bf16.msra.mxu0 %v1228_v8 }
  0x69   : > { %1080 = vmatprep.subr.bf16.mxu0 %v1229_v16  ;;  %290 = vadd.xlane.f32.xlu0 %v268_v22 }
  0x6a   : > { %292 = vadd.xlane.f32.xlu1 %v269_v23  ;;  %1111 = vmatpush3.bf16.msra.mxu1 %v1236_v41 }
  0x6b   : > { %1112 = vmatprep.subr.bf16.mxu1 %v1237_v42 }
  0x6c   : > { %1081 = vmatpush3.bf16.msra.mxu0 %v1229_v16 }
  0x6d   : > { %1082 = vmatprep.subr.bf16.mxu0 %v1230_v20  ;;  %294 = vadd.xlane.f32.xlu0 %v270_v26 }
  0x6e   : > { %296 = vadd.xlane.f32.xlu1 %v271_v27  ;;  %1113 = vmatpush3.bf16.msra.mxu1 %v1237_v42 }
  0x6f   : > { %1114 = vmatprep.subr.bf16.mxu1 %v1238_v43 }
  0x70   : > { %1083 = vmatpush3.bf16.msra.mxu0 %v1230_v20 }
  0x71   : > { %1084 = vmatprep.subr.bf16.mxu0 %v1231_v25  ;;  %298 = vadd.xlane.f32.xlu0 %v272_v31 }
  0x72   : > { %300 = vadd.xlane.f32.xlu1 %v273_v32  ;;  %1115 = vmatpush3.bf16.msra.mxu1 %v1238_v43 }
  0x73   : > { %1116 = vmatprep.subr.bf16.mxu1 %v1239_v44 }
  0x74   : > { %1085 = vmatpush3.bf16.msra.mxu0 %v1231_v25 }
  0x75   : > { %302 = vadd.xlane.f32.xlu0 %v274_v35 }
  0x76   : > { %304 = vadd.xlane.f32.xlu1 %v275_v36  ;;  %1117 = vmatpush3.bf16.msra.mxu1 %v1239_v44 }
  0x77   : > { %1087 = vmatmul.mubr.bf16.vlgmr.msra.gmra.mxu0 %v255_v7 }
  0x78   : > { %1090 = vmatprep.mubr.bf16.mxu0 %v256_v15 }
  0x79   : > { %306 = vadd.xlane.f32.xlu0 %v276_v39 }
  0x7a   : > { %308 = vadd.xlane.f32.xlu1 %v277_v40 }
  0x7f   : > { %1091 = vmatmul.mubr.bf16.gmra.mxu0 %v257_v19 }
  0x80   : > { %1094 = vmatprep.mubr.bf16.mxu0 %v258_v24 }
  0x87   : > { %1095 = vmatmul.mubr.bf16.gmra.mxu0 %v259_v29 }
  0x88   : > { %1098 = vmatprep.mubr.bf16.mxu0 %v260_v34 }
  0x8f   : > { %1099 = vmatmul.mubr.bf16.gmra.mxu0 %v261_v38 }
  0xe6   : > { %v279_v46 = vpop.xlane.xlu0 %278 }
  0xe7   : > { %v283_v45 = vpop.xlane.xlu1 %282  ;;  %v310_v52 = vmax.f32 %v279_v46, 1.0 }
  0xe8   : > { %v312_v56 = vmax.f32 %v283_v45, 1.0 }
  0xe9   : > { %1240 = vrcp.f32 %v310_v52 }
  0xea   : > { %v281_v48 = vpop.xlane.xlu0 %280 }
  0xeb   : > { %v285_v47 = vpop.xlane.xlu1 %284  ;;  %v311_v55 = vmax.f32 %v281_v48, 1.0 }
  0xec   : > { %v313_v54 = vmax.f32 %v285_v47, 1.0 }
  0xee   : > { %v287_v50 = vpop.xlane.xlu0 %286  ;;  %1242 = vrcp.f32 %v313_v54 }
  0xef   : > { %v289_v49 = vpop.xlane.xlu1 %288  ;;  %1244 = vrcp.f32 %v311_v55  ;;  %v314_v60 = vmax.f32 %v287_v50, 1.0 }
  0xf0   : > { %1246 = vrcp.f32 %v312_v56  ;;  %v315_v63 = vmax.f32 %v289_v49, 1.0 }
  0xf2   : > { %v291_v53 = vpop.xlane.xlu0 %290 }
  0xf3   : > { %v293_v51 = vpop.xlane.xlu1 %292  ;;  %v316_v62 = vmax.f32 %v291_v53, 1.0 }
  0xf4   : > { %v317_v59 = vmax.f32 %v293_v51, 1.0 }
  0xf6   : > { %v295_v58 = vpop.xlane.xlu0 %294  ;;  %1248 = vrcp.f32 %v317_v59  ;;  %v1241_v3 = vpop.eup %1240 }
  0xf7   : > { %v297_v57 = vpop.xlane.xlu1 %296  ;;  %1250 = vrcp.f32 %v314_v60  ;;  %v318_v7 = vmax.f32 %v295_v58, 1.0 }
  0xf8   : > { %1252 = vrcp.f32 %v316_v62  ;;  %v319_v13 = vmax.f32 %v297_v57, 1.0 }
  0xf9   : > { %1254 = vrcp.f32 %v315_v63 }
  0xfa   : > { %v299_v0 = vpop.xlane.xlu0 %298 }
  0xfb   : > { %v301_v61 = vpop.xlane.xlu1 %300  ;;  %v1243_v6 = vpop.eup %1242  ;;  %v320_v10 = vmax.f32 %v299_v0, 1.0 }
  0xfc   : > { %v321_v5 = vmax.f32 %v301_v61, 1.0  ;;  %v1245_v9 = vpop.eup %1244 }
  0xfd   : > { %v1247_v12 = vpop.eup %1246 }
  0xfe   : > { %v303_v8 = vpop.xlane.xlu0 %302  ;;  %1256 = vrcp.f32 %v321_v5  ;;  %v564_v5 = vld [vmem:[#allocation8 + $0x10] sm:$0xff] }
  0xff   : > { %v305_v2 = vpop.xlane.xlu1 %304  ;;  %1258 = vrcp.f32 %v318_v7  ;;  %v322_v27 = vmax.f32 %v303_v8, 1.0  ;;  %v562_v7 = vld [vmem:[#allocation8] sm:$0xff] }
 0x100   : > { %1260 = vrcp.f32 %v320_v10  ;;  %v323_v32 = vmax.f32 %v305_v2, 1.0  ;;  %v565_v10 = vld [vmem:[#allocation8 + $0x18] sm:$0xff] }
 0x101   : > { %1262 = vrcp.f32 %v319_v13  ;;  %v563_v13 = vld [vmem:[#allocation8 + $0x8] sm:$0xff] }
 0x102   : > { %v307_v21 = vpop.xlane.xlu0 %306 }
 0x103   : > { %v309_v18 = vpop.xlane.xlu1 %308  ;;  %v1249_v26 = vpop.eup %1248  ;;  %v324_v29 = vmax.f32 %v307_v21, 1.0 }
 0x104   : > { %v325_v25 = vmax.f32 %v309_v18, 1.0  ;;  %v1251_v28 = vpop.eup %1250 }
 0x105   : > { %v1253_v31 = vpop.eup %1252 }
 0x106   : > { %v1255_v33 = vpop.eup %1254  ;;  %1264 = vrcp.f32 %v325_v25  ;;  %v567_v25 = vld [vmem:[#allocation8 + $0x28] sm:$0xff] }
 0x107   : > { %1266 = vrcp.f32 %v322_v27 }
 0x108   : > { %1268 = vrcp.f32 %v324_v29 }
 0x109   : > { %1270 = vrcp.f32 %v323_v32 }
 0x10b   : > { %v1257_v43 = vpop.eup %1256 }
 0x10c   : > { %v1259_v44 = vpop.eup %1258 }
 0x10d   : > { %v1261_v46 = vpop.eup %1260 }
 0x10e   : > { %v1263_v47 = vpop.eup %1262 }
 0x113   : > { %v1265_v57 = vpop.eup %1264 }
 0x114   : > { %v1267_v58 = vpop.eup %1266 }
 0x115   : > { %v1269_v60 = vpop.eup %1268 }
 0x116   : > { %v1271_v61 = vpop.eup %1270 }
 0x137   : > { %v1088_v1 = vpop.f32.mrf.mxu0 }
 0x138   : > { %v540_v19 = vmul.f32 %v1247_v12, %v1088_v1 }
 0x139   : > { %v475_v4 = vpop.f32.mrf.mxu0 }
 0x13a   : > { %v538_v16 = vmul.f32 %v1241_v3, %v475_v4 }
 0x13b   : > { %v1089_v11 = vpop.f32.mrf.mxu0 }
 0x13c   : > { %v541_v14 = vmul.f32 %v1243_v6, %v1089_v11 }
 0x13d   : > { %v478_v15 = vpop.f32.mrf.mxu0 }
 0x13e   : > { %v539_v17 = vmul.f32 %v1245_v9, %v478_v15  ;;  %v555_v23 = vpack.c.bf16 %v541_v14, %v540_v19  ;;  %v566_v19 = vld [vmem:[#allocation8 + $0x20] sm:$0xff] }
 0x13f   : > { %v1092_v20 = vpop.f32.mrf.mxu0 }
 0x140   : > { %v554_v22 = vpack.c.bf16 %v539_v17, %v538_v16  ;;  %v544_v38 = vmul.f32 %v1253_v31, %v1092_v20  ;;  %v568_v16 = vld [vmem:[#allocation8 + $0x30] sm:$0xff]  ;;  %v570_v31 = vld [vmem:[#allocation8 + $0x40] sm:$0xff] }
 0x141   : > { %v491_v24 = vpop.f32.mrf.mxu0 }
 0x142   : > { %1118 = vmatprep.mubr.bf16.mxu1 %v554_v22  ;;  %v542_v36 = vmul.f32 %v1251_v28, %v491_v24  ;;  %v569_v22 = vld [vmem:[#allocation8 + $0x38] sm:$0xff]  ;;  %v572_v28 = vld [vmem:[#allocation8 + $0x50] sm:$0xff] }
 0x143   : > { %v1093_v30 = vpop.f32.mrf.mxu0  ;;  %1119 = vmatmul.mubr.bf16.vlgmr.msra.gmra.mxu1 %v555_v23 }
 0x144   : > { %v545_v34 = vmul.f32 %v1249_v26, %v1093_v30 }
 0x145   : > { %v494_v35 = vpop.f32.mrf.mxu0 }
 0x146   : > { %v543_v37 = vmul.f32 %v1255_v33, %v494_v35  ;;  %v557_v41 = vpack.c.bf16 %v545_v34, %v544_v38  ;;  %v573_v34 = vld [vmem:[#allocation8 + $0x58] sm:$0xff] }
 0x147   : > { %v1096_v39 = vpop.f32.mrf.mxu0 }
 0x148   : > { %v556_v40 = vpack.c.bf16 %v543_v37, %v542_v36  ;;  %v548_v52 = vmul.f32 %v1261_v46, %v1096_v39  ;;  %v571_v37 = vld [vmem:[#allocation8 + $0x48] sm:$0xff]  ;;  %v577_v46 = vld [vmem:[#allocation8 + $0x78] sm:$0xff] }
 0x149   : > { %v507_v42 = vpop.f32.mrf.mxu0 }
 0x14a   : > { %1122 = vmatprep.mubr.bf16.mxu1 %v556_v40  ;;  %v546_v50 = vmul.f32 %v1259_v44, %v507_v42  ;;  %v576_v40 = vld [vmem:[#allocation8 + $0x70] sm:$0xff] }
 0x14b   : > { %v1097_v45 = vpop.f32.mrf.mxu0  ;;  %1123 = vmatmul.mubr.bf16.gmra.mxu1 %v557_v41 }
 0x14c   : > { %v549_v48 = vmul.f32 %v1257_v43, %v1097_v45  ;;  %v574_v43 = vld [vmem:[#allocation8 + $0x60] sm:$0xff] }
 0x14d   : > { %v510_v49 = vpop.f32.mrf.mxu0 }
 0x14e   : > { %v547_v51 = vmul.f32 %v1263_v47, %v510_v49  ;;  %v559_v55 = vpack.c.bf16 %v549_v48, %v548_v52  ;;  %v575_v49 = vld [vmem:[#allocation8 + $0x68] sm:$0xff] }
 0x14f   : > { %v1100_v53 = vpop.f32.mrf.mxu0 }
 0x150   : > { %v558_v54 = vpack.c.bf16 %v547_v51, %v546_v50  ;;  %v552_v2 = vmul.f32 %v1269_v60, %v1100_v53 }
 0x151   : > { %v523_v56 = vpop.f32.mrf.mxu0 }
 0x152   : > { %1126 = vmatprep.mubr.bf16.mxu1 %v558_v54  ;;  %v550_v0 = vmul.f32 %v1267_v58, %v523_v56 }
 0x153   : > { %v1101_v59 = vpop.f32.mrf.mxu0  ;;  %1127 = vmatmul.mubr.bf16.gmra.mxu1 %v559_v55 }
 0x154   : > { %v553_v62 = vmul.f32 %v1265_v57, %v1101_v59 }
 0x155   : > { %v526_v63 = vpop.f32.mrf.mxu0 }
 0x156   : > { %v551_v1 = vmul.f32 %v1271_v61, %v526_v63  ;;  %v561_v4 = vpack.c.bf16 %v553_v62, %v552_v2 }
 0x158   : > { %v560_v3 = vpack.c.bf16 %v551_v1, %v550_v0 }
 0x15a   : > { %1130 = vmatprep.mubr.bf16.mxu1 %v560_v3 }
 0x15b   : > { %1131 = vmatmul.mubr.bf16.gmra.mxu1 %v561_v4 }
 0x203   : > { %v1120_v6 = vpop.f32.mrf.mxu1 }
 0x204   : > { %v725_v8 = vadd.f32 %v1120_v6, %v564_v5 }
 0x205   : > { %v660_v9 = vpop.f32.mrf.mxu1 }
 0x206   : > { %741 = vst [vmem:[#allocation8 + $0x10] sm:$0xff] %v725_v8  ;;  %v723_v11 = vadd.f32 %v660_v9, %v562_v7 }
 0x207   : > { %v1121_v12 = vpop.f32.mrf.mxu1 }
 0x208   : > { %739 = vst [vmem:[#allocation8] sm:$0xff] %v723_v11  ;;  %v726_v14 = vadd.f32 %v1121_v12, %v565_v10 }
 0x209   : > { %v663_v15 = vpop.f32.mrf.mxu1 }
 0x20a   : > { %742 = vst [vmem:[#allocation8 + $0x18] sm:$0xff] %v726_v14  ;;  %v724_v17 = vadd.f32 %v663_v15, %v563_v13 }
 0x20b   : > { %v1124_v18 = vpop.f32.mrf.mxu1 }
 0x20c   : > { %740 = vst [vmem:[#allocation8 + $0x8] sm:$0xff] %v724_v17  ;;  %v729_v20 = vadd.f32 %v1124_v18, %v568_v16 }
 0x20d   : > { %v676_v21 = vpop.f32.mrf.mxu1 }
 0x20e   : > { %745 = vst [vmem:[#allocation8 + $0x30] sm:$0xff] %v729_v20  ;;  %v727_v23 = vadd.f32 %v676_v21, %v566_v19 }
 0x20f   : > { %v1125_v24 = vpop.f32.mrf.mxu1 }
 0x210   : > { %743 = vst [vmem:[#allocation8 + $0x20] sm:$0xff] %v727_v23  ;;  %v730_v26 = vadd.f32 %v1125_v24, %v569_v22 }
 0x211   : > { %v679_v27 = vpop.f32.mrf.mxu1 }
 0x212   : > { %746 = vst [vmem:[#allocation8 + $0x38] sm:$0xff] %v730_v26  ;;  %v728_v29 = vadd.f32 %v679_v27, %v567_v25 }
 0x213   : > { %v1128_v30 = vpop.f32.mrf.mxu1 }
 0x214   : > { %744 = vst [vmem:[#allocation8 + $0x28] sm:$0xff] %v728_v29  ;;  %v733_v32 = vadd.f32 %v1128_v30, %v572_v28 }
 0x215   : > { %v692_v33 = vpop.f32.mrf.mxu1 }
 0x216   : > { %749 = vst [vmem:[#allocation8 + $0x50] sm:$0xff] %v733_v32  ;;  %v731_v35 = vadd.f32 %v692_v33, %v570_v31 }
 0x217   : > { %v1129_v36 = vpop.f32.mrf.mxu1 }
 0x218   : > { %747 = vst [vmem:[#allocation8 + $0x40] sm:$0xff] %v731_v35  ;;  %v734_v38 = vadd.f32 %v1129_v36, %v573_v34 }
 0x219   : > { %v695_v39 = vpop.f32.mrf.mxu1 }
 0x21a   : > { %750 = vst [vmem:[#allocation8 + $0x58] sm:$0xff] %v734_v38  ;;  %v732_v41 = vadd.f32 %v695_v39, %v571_v37 }
 0x21b   : > { %v1132_v42 = vpop.f32.mrf.mxu1 }
 0x21c   : > { %748 = vst [vmem:[#allocation8 + $0x48] sm:$0xff] %v732_v41  ;;  %v737_v44 = vadd.f32 %v1132_v42, %v576_v40 }
 0x21d   : > { %v708_v45 = vpop.f32.mrf.mxu1 }
 0x21e   : > { %753 = vst [vmem:[#allocation8 + $0x70] sm:$0xff] %v737_v44  ;;  %v735_v47 = vadd.f32 %v708_v45, %v574_v43 }
 0x21f   : > { %v1133_v48 = vpop.f32.mrf.mxu1 }
 0x220   : > { %751 = vst [vmem:[#allocation8 + $0x60] sm:$0xff] %v735_v47  ;;  %v738_v50 = vadd.f32 %v1133_v48, %v577_v46  ;;  %758 = sbr.rel (%p1015_p4) target bundleno = 598 (0x256), region = 52 }
 0x221   : > { %v711_v51 = vpop.f32.mrf.mxu1 }
 0x222   : > { %754 = vst [vmem:[#allocation8 + $0x78] sm:$0xff] %v738_v50  ;;  %v736_v52 = vadd.f32 %v711_v51, %v575_v49 }
 0x224   : > { %752 = vst [vmem:[#allocation8 + $0x68] sm:$0xff] %v736_v52 }
 0x225   : > { %v759_v53 = vld [vmem:[#allocation8] sm:$0xff]  ;;  %v760_v54 = vld [vmem:[#allocation8 + $0x8] sm:$0xff]  ;;  %v761_v55 = vld [vmem:[#allocation8 + $0x10] sm:$0xff] }
 0x226   : > { %v1016_v56 = vmul.f32 -1.442695, %v759_v53  ;;  %v1017_v57 = vmul.f32 -1.442695, %v760_v54  ;;  %v1018_v58 = vmul.f32 -1.442695, %v761_v55 }
 0x227   : > { %v762_v59 = vld [vmem:[#allocation8 + $0x18] sm:$0xff]  ;;  %v763_v60 = vld [vmem:[#allocation8 + $0x20] sm:$0xff]  ;;  %v764_v61 = vld [vmem:[#allocation8 + $0x28] sm:$0xff] }
 0x228   : > { %1272 = vpow2.f32 %v1016_v56  ;;  %v1019_v62 = vmul.f32 -1.442695, %v762_v59  ;;  %v1020_v63 = vmul.f32 -1.442695, %v763_v60  ;;  %v1021_v0 = vmul.f32 -1.442695, %v764_v61 }
 0x229   : > { %1274 = vpow2.f32 %v1017_v57  ;;  %v765_v1 = vld [vmem:[#allocation8 + $0x30] sm:$0xff]  ;;  %v766_v2 = vld [vmem:[#allocation8 + $0x38] sm:$0xff]  ;;  %v767_v3 = vld [vmem:[#allocation8 + $0x40] sm:$0xff] }
 0x22a   : > { %1276 = vpow2.f32 %v1018_v58  ;;  %v1022_v4 = vmul.f32 -1.442695, %v765_v1  ;;  %v1023_v5 = vmul.f32 -1.442695, %v766_v2  ;;  %v768_v6 = vld [vmem:[#allocation8 + $0x48] sm:$0xff]  ;;  %v769_v7 = vld [vmem:[#allocation8 + $0x50] sm:$0xff] }
 0x22b   : > { %1278 = vpow2.f32 %v1019_v62  ;;  %v1024_v8 = vmul.f32 -1.442695, %v767_v3  ;;  %v770_v9 = vld [vmem:[#allocation8 + $0x58] sm:$0xff]  ;;  %v1025_v10 = vmul.f32 -1.442695, %v768_v6  ;;  %v771_v11 = vld [vmem:[#allocation8 + $0x60] sm:$0xff] }
 0x22c   : > { %1280 = vpow2.f32 %v1020_v63  ;;  %v1026_v12 = vmul.f32 -1.442695, %v769_v7  ;;  %v772_v13 = vld [vmem:[#allocation8 + $0x68] sm:$0xff]  ;;  %v1027_v14 = vmul.f32 -1.442695, %v770_v9  ;;  %v773_v15 = vld [vmem:[#allocation8 + $0x70] sm:$0xff] }
 0x22d   : > { %1282 = vpow2.f32 %v1021_v0  ;;  %v1028_v16 = vmul.f32 -1.442695, %v771_v11  ;;  %v774_v17 = vld [vmem:[#allocation8 + $0x78] sm:$0xff]  ;;  %v1029_v18 = vmul.f32 -1.442695, %v772_v13 }
 0x22e   : > { %1284 = vpow2.f32 %v1022_v4  ;;  %v1030_v19 = vmul.f32 -1.442695, %v773_v15  ;;  %v1031_v20 = vmul.f32 -1.442695, %v774_v17 }
 0x22f   : > { %1286 = vpow2.f32 %v1023_v5 }
 0x230   : > { %1288 = vpow2.f32 %v1024_v8 }
 0x231   : > { %1290 = vpow2.f32 %v1025_v10 }
 0x232   : > { %1292 = vpow2.f32 %v1026_v12 }
 0x233   : > { %1294 = vpow2.f32 %v1027_v14 }
 0x234   : > { %1296 = vpow2.f32 %v1028_v16 }
 0x235   : > { %v1273_v21 = vpop.eup %1272  ;;  %1298 = vpow2.f32 %v1029_v18 }
 0x236   : > { %v1275_v22 = vpop.eup %1274  ;;  %v823_v23 = vadd.f32 1.0, %v1273_v21  ;;  %1300 = vpow2.f32 %v1030_v19 }
 0x237   : > { %v1277_v24 = vpop.eup %1276  ;;  %v824_v25 = vadd.f32 1.0, %v1275_v22  ;;  %1302 = vpow2.f32 %v1031_v20 }
 0x238   : > { %v1279_v26 = vpop.eup %1278  ;;  %1304 = vrcp.f32 %v823_v23  ;;  %v825_v27 = vadd.f32 1.0, %v1277_v24 }
 0x239   : > { %v1281_v28 = vpop.eup %1280  ;;  %1306 = vrcp.f32 %v824_v25  ;;  %v826_v29 = vadd.f32 1.0, %v1279_v26 }
 0x23a   : > { %v1283_v30 = vpop.eup %1282  ;;  %1308 = vrcp.f32 %v825_v27  ;;  %v827_v31 = vadd.f32 1.0, %v1281_v28 }
 0x23b   : > { %v1285_v32 = vpop.eup %1284  ;;  %1310 = vrcp.f32 %v826_v29  ;;  %v828_v33 = vadd.f32 1.0, %v1283_v30 }
 0x23c   : > { %v1287_v34 = vpop.eup %1286  ;;  %1312 = vrcp.f32 %v827_v31  ;;  %v829_v35 = vadd.f32 1.0, %v1285_v32 }
 0x23d   : > { %v1289_v36 = vpop.eup %1288  ;;  %1314 = vrcp.f32 %v828_v33  ;;  %v830_v37 = vadd.f32 1.0, %v1287_v34 }
 0x23e   : > { %v1291_v38 = vpop.eup %1290  ;;  %1316 = vrcp.f32 %v829_v35  ;;  %v831_v39 = vadd.f32 1.0, %v1289_v36 }
 0x23f   : > { %v1293_v40 = vpop.eup %1292  ;;  %1318 = vrcp.f32 %v830_v37  ;;  %v832_v41 = vadd.f32 1.0, %v1291_v38 }
 0x240   : > { %v1295_v42 = vpop.eup %1294  ;;  %1320 = vrcp.f32 %v831_v39  ;;  %v833_v43 = vadd.f32 1.0, %v1293_v40 }
 0x241   : > { %v1297_v44 = vpop.eup %1296  ;;  %1322 = vrcp.f32 %v832_v41  ;;  %v834_v45 = vadd.f32 1.0, %v1295_v42 }
 0x242   : > { %v1299_v46 = vpop.eup %1298  ;;  %1324 = vrcp.f32 %v833_v43  ;;  %v835_v47 = vadd.f32 1.0, %v1297_v44 }
 0x243   : > { %v1301_v48 = vpop.eup %1300  ;;  %1326 = vrcp.f32 %v834_v45  ;;  %v836_v49 = vadd.f32 1.0, %v1299_v46 }
 0x244   : > { %v1303_v50 = vpop.eup %1302  ;;  %1328 = vrcp.f32 %v835_v47  ;;  %v837_v51 = vadd.f32 1.0, %v1301_v48 }
 0x245   : > { %v1305_v52 = vpop.eup %1304  ;;  %1330 = vrcp.f32 %v836_v49  ;;  %v838_v53 = vadd.f32 1.0, %v1303_v50 }
 0x246   : > { %v1307_v54 = vpop.eup %1306  ;;  %871 = vst [vmem:[#allocation8] sm:$0xff] %v1305_v52  ;;  %1332 = vrcp.f32 %v837_v51 }
 0x247   : > { %v1309_v55 = vpop.eup %1308  ;;  %872 = vst [vmem:[#allocation8 + $0x8] sm:$0xff] %v1307_v54  ;;  %1334 = vrcp.f32 %v838_v53 }
 0x248   : > { %v1311_v56 = vpop.eup %1310  ;;  %873 = vst [vmem:[#allocation8 + $0x10] sm:$0xff] %v1309_v55 }
 0x249   : > { %v1313_v57 = vpop.eup %1312  ;;  %874 = vst [vmem:[#allocation8 + $0x18] sm:$0xff] %v1311_v56 }
 0x24a   : > { %v1315_v58 = vpop.eup %1314  ;;  %875 = vst [vmem:[#allocation8 + $0x20] sm:$0xff] %v1313_v57 }
 0x24b   : > { %v1317_v59 = vpop.eup %1316  ;;  %876 = vst [vmem:[#allocation8 + $0x28] sm:$0xff] %v1315_v58 }
 0x24c   : > { %v1319_v60 = vpop.eup %1318  ;;  %877 = vst [vmem:[#allocation8 + $0x30] sm:$0xff] %v1317_v59 }
 0x24d   : > { %v1321_v61 = vpop.eup %1320  ;;  %878 = vst [vmem:[#allocation8 + $0x38] sm:$0xff] %v1319_v60 }
 0x24e   : > { %v1323_v62 = vpop.eup %1322  ;;  %879 = vst [vmem:[#allocation8 + $0x40] sm:$0xff] %v1321_v61 }
 0x24f   : > { %v1325_v63 = vpop.eup %1324  ;;  %880 = vst [vmem:[#allocation8 + $0x48] sm:$0xff] %v1323_v62 }
 0x250   : > { %v1327_v0 = vpop.eup %1326  ;;  %881 = vst [vmem:[#allocation8 + $0x50] sm:$0xff] %v1325_v63 }
 0x251   : > { %v1329_v1 = vpop.eup %1328  ;;  %882 = vst [vmem:[#allocation8 + $0x58] sm:$0xff] %v1327_v0 }
 0x252   : > { %v1331_v2 = vpop.eup %1330  ;;  %883 = vst [vmem:[#allocation8 + $0x60] sm:$0xff] %v1329_v1 }
 0x253   : > { %v1333_v3 = vpop.eup %1332  ;;  %884 = vst [vmem:[#allocation8 + $0x68] sm:$0xff] %v1331_v2 }
 0x254   : > { %v1335_v4 = vpop.eup %1334  ;;  %885 = vst [vmem:[#allocation8 + $0x70] sm:$0xff] %v1333_v3 }
 0x255   : > { %886 = vst [vmem:[#allocation8 + $0x78] sm:$0xff] %v1335_v4 }
 0x256 PF: > { %p1665_p2 = scmp.eq.s32.totalorder %s984_s18, 2  ;;  %s1508_s21 = smov [#allocation8]  }
 0x257   : > { %s896_s25 = sshll.u32 %s1508_s21, 4  ;;  %s897_s25 = int_to_ptr.vmem [resolvable:$true] %s896_s25 }
 0x258   : > { %s1416_s26 = scalar_lea.vmem %s897_s25, 2048  ;;  %p1423_p9 = scmp.lt.s32.totalorder %s897_s25, %s897_s25 }
 0x259   : > { %p1417_p3 = scmp.ne.s32.totalorder %s897_s25, %s1416_s26  ;;  %p1424_p10 = scmp.lt.s32.totalorder %s1416_s26, %s1416_s26 }
 0x25b   : > { %p1418_p7 = pnand %p1417_p3, %p1665_p2  ;;  %p1425_p12 = por %p1424_p10, %p1423_p9 }
 0x25d   : > { %p1419_p6 = pneg %p1418_p7 }
 0x25f   : > { %p1426_p11 = pnand %p1425_p12, %p1419_p6 }
 0x261   : > { %1429 = shalt.err (!%p1426_p11)
}
 0x262   : > { %s1509_s27 = smov 128   ;;  %s1510_s18 = smov 8  }
 0x263   : > { %1145 = dma.vmem_to_hbm [thread:$0]  (%p1665_p2), %s897_s25, 2048, %s1701_s3, [#allocation4], %s1509_s27, %s1509_s27, %s1510_s18  }
 0x264   : > { %1473 = dma.done.wait (%p1665_p2), [#allocation4], 2048  }
 0x265   : > { %1475 = vsyncadd (%p1665_p2), [#allocation4], 4294965248 }
 0x266 PF: > { %s18_s17 = sadd.s32 1, %s1498_s17   ;;  %s1711_s12 = smov %s1482_s13 }
 0x267   : > { %p15_p1 = scmp.ge.s32.totalorder %s18_s17, 5   ;;  %s1712_s13 = smov %s1486_s14 }
 0x268   : > { %s1713_s14 = smov %s1618_s23  ;;  %s1714_s15 = smov %s1494_s16 }
 0x269   : > { %s1715_s16 = smov %s1717_s8  ;;  %17 = sbr.rel (!%p15_p1) target bundleno = 6 (0x6), region = 87 }
 0x26e   :  { %912 = vsyncpa [#allocation3], 1 }
 0x26f   :  { %914 = vsyncpa [#allocation3 + $0x1], 1 }
 0x270   :  { %915 = vsyncpa [#allocation6], 1 }
 0x271   :  { %916 = vsyncpa [#allocation4], 1 }
 0x272   :  { %918 = vsyncpa [#allocation4 + $0x1], 1 }

</bundles_post_ra>
